<compile_context>
chip_gen: v7x
topology: tpu7x:2x2x1
jax: 0.10.0
libtpu: 0.0.40
codegen_flags: <defaults>
</compile_context>

<pallas_src>
import jax
import jax.numpy as jnp
from jax import lax
from jax.experimental import pallas as pl
from jax.experimental.pallas import tpu as pltpu


def _calib_logits_kernel(scale_ref, img_ref, txt_ref, out_ref):
    # scale_ref: SMEM (1,) holding exp(logit_scale)  (pre-computed in wrapper)
    # img_ref:   VMEM tile (B, D)   -- fully resident across the grid
    # txt_ref:   VMEM tile (TC, D)  -- streamed over class blocks
    # out_ref:   VMEM tile (B, TC)
    sims = lax.dot_general(
        img_ref[...], txt_ref[...],
        dimension_numbers=(((1,), (1,)), ((), ())),   # contract shared last dim
        preferred_element_type=jnp.float32)
    out_ref[...] = (scale_ref[0] * sims).astype(out_ref.dtype)


def _pick_class_tile(C):
    """Class-axis tile: multiple of 128 (lane/MXU aligned).  Prefer the largest
    tile that still gives >= 2 grid blocks (both v7x cores get work, per-step
    overhead amortized); tiny C uses the full extent (valid per (8,128) rule)."""
    if C <= 128:
        return C
    for tc in (512, 384, 256, 128):
        if pl.cdiv(C, tc) >= 2:
            return tc
    return 128


def clip_calibration_logits(image_features, text_features, logit_scale_param,
                            *, tc=None):
    """logits = exp(logit_scale_param) * image_features @ text_features.T"""
    B, D = image_features.shape
    C, Dt = text_features.shape
    assert D == Dt, "feature dims of image and text embeddings must match"

    # Hoisted out of the kernel: scalar exp computed once on the wrapper side.
    scale = jnp.exp(jnp.asarray(logit_scale_param, dtype=jnp.float32)).reshape((1,))

    if tc is None:
        tc = _pick_class_tile(C)

    # Pad classes up to a tile multiple (ragged C support), slice afterwards.
    C_pad = pl.cdiv(C, tc) * tc
    txt = text_features
    if C_pad != C:
        txt = jnp.pad(text_features, ((0, C_pad - C), (0, 0)))

    grid = (C_pad // tc,)

    out = pl.pallas_call(
        _calib_logits_kernel,
        out_shape=jax.ShapeDtypeStruct((B, C_pad), jnp.float32),
        grid_spec=pltpu.PrefetchScalarGridSpec(
            num_scalar_prefetch=0,
            grid=grid,
            in_specs=[
                pl.BlockSpec(memory_space=pltpu.MemorySpace.SMEM),  # exp(scale)
                pl.BlockSpec((B, D), lambda j: (0, 0)),   # image feats, resident
                pl.BlockSpec((tc, D), lambda j: (j, 0)),  # text feats, streamed
            ],
            out_specs=pl.BlockSpec((B, tc), lambda j: (0, j)),
        ),
        compiler_params=pltpu.CompilerParams(
            dimension_semantics=("parallel",)),
    )(scale, image_features, txt)

    if C_pad != C:
        out = out[:, :C]
    return out


def custom_clip_calibration_forward(image_features, text_features,
                                    logit_scale_param):
    """Mirrors CustomCLIPCalibration.forward: returns (logits, image_features,
    text_features)."""
    # TODO(synk): the base_model (CLIP image/text encoders) is an external
    # pretrained network; only its output features participate in this forward.
    logits = clip_calibration_logits(image_features, text_features,
                                     logit_scale_param)
    return logits, image_features, text_features


if __name__ == "__main__":
    key = jax.random.PRNGKey(0)
    k_img, k_txt = jax.random.split(key)

    B, C, D = 8, 256, 64   # batch, num classes (text prompts), feature dim

    # Synthetic stand-ins for the (external) CLIP encoder outputs.
    img_feat = jax.random.normal(k_img, (B, D), dtype=jnp.float32)
    txt_feat = jax.random.normal(k_txt, (C, D), dtype=jnp.float32)
    img_feat = img_feat / jnp.linalg.norm(img_feat, axis=-1, keepdims=True)
    txt_feat = txt_feat / jnp.linalg.norm(txt_feat, axis=-1, keepdims=True)

    # ScaleLearner parameter, deterministic init from the module's __init__.
    logit_scale_param = jnp.float32(4.6052)

    logits, img_out, txt_out = custom_clip_calibration_forward(
        img_feat, txt_feat, logit_scale_param)
    jax.block_until_ready(logits)

    # Reference check (plain JAX).
    ref = jnp.exp(logit_scale_param) * (img_feat @ txt_feat.T)
    assert logits.shape == (B, C)
    assert jnp.allclose(logits, ref, atol=1e-3, rtol=1e-3)

    print("KERNEL_OK")
</pallas_src>

<mosaic_0001>
module attributes {stable_mosaic.version = 11 : i64} {
  func.func @_calib_logits_kernel(%arg0: i32, %arg1: memref<1xf32, #tpu.memory_space<smem>>, %arg2: memref<8x64xf32, #tpu.memory_space<vmem>>, %arg3: memref<128x64xf32, #tpu.memory_space<vmem>>, %arg4: memref<8x128xf32, #tpu.memory_space<vmem>>) attributes {dimension_semantics = [#tpu.dimension_semantics<parallel>], iteration_bounds = array<i64: 2>, scalar_prefetch = 0 : i64, scratch_operands = 0 : i64, tpu.core_type = #tpu.core_type<tc>, window_params = [{transform_indices = @transform_0, window_bounds = array<i64: 1>}, {pipeline_mode = #tpu.pipeline_mode<synchronous>, transform_indices = @transform_1, window_bounds = array<i64: 8, 64>}, {transform_indices = @transform_2, window_bounds = array<i64: 128, 64>}, {transform_indices = @transform_3, window_bounds = array<i64: 8, 128>}]} {
    %c0 = arith.constant 0 : index
    %c0_0 = arith.constant 0 : index
    %0 = vector.load %arg2[%c0, %c0_0] : memref<8x64xf32, #tpu.memory_space<vmem>>, vector<8x64xf32>
    %c0_1 = arith.constant 0 : index
    %c0_2 = arith.constant 0 : index
    %1 = vector.load %arg3[%c0_1, %c0_2] : memref<128x64xf32, #tpu.memory_space<vmem>>, vector<128x64xf32>
    %cst = arith.constant dense<0.000000e+00> : vector<8x128xf32>
    %2 = tpu.matmul %0, %1, %cst {dimension_numbers = #tpu.dot_dimension_numbers<[1], [1], [0], [0], [0, 0, 1, 0], [], []>} : vector<8x64xf32>, vector<128x64xf32>, vector<8x128xf32> -> vector<8x128xf32>
    %c0_3 = arith.constant 0 : index
    %3 = memref.load %arg1[%c0_3] : memref<1xf32, #tpu.memory_space<smem>>
    %4 = vector.broadcast %3 : f32 to vector<8x128xf32>
    %5 = arith.mulf %4, %2 : vector<8x128xf32>
    %c0_4 = arith.constant 0 : index
    %c0_5 = arith.constant 0 : index
    %6 = vector.load %arg4[%c0_4, %c0_5] : memref<8x128xf32, #tpu.memory_space<vmem>>, vector<8x128xf32>
    tpu.vector_store %arg4[%c0_4, %c0_5], %5 {strides = array<i32>} : memref<8x128xf32, #tpu.memory_space<vmem>>, vector<8x128xf32>,
    return
  }
  func.func @transform_0(%arg0: i32) -> i32 {
    %c0_i32 = arith.constant 0 : i32
    %c0_i32_0 = arith.constant 0 : i32
    return %c0_i32 : i32
  }
  func.func @transform_1(%arg0: i32) -> (i32, i32) {
    %c0_i32 = arith.constant 0 : i32
    %c0_i32_0 = arith.constant 0 : i32
    %c0_i32_1 = arith.constant 0 : i32
    return %c0_i32, %c0_i32_0 : i32, i32
  }
  func.func @transform_2(%arg0: i32) -> (i32, i32) {
    %c0_i32 = arith.constant 0 : i32
    %c0_i32_0 = arith.constant 0 : i32
    return %arg0, %c0_i32 : i32, i32
  }
  func.func @transform_3(%arg0: i32) -> (i32, i32) {
    %c0_i32 = arith.constant 0 : i32
    %c0_i32_0 = arith.constant 0 : i32
    return %c0_i32, %arg0 : i32, i32
  }
}

</mosaic_0001>

<bundles_post_ra>
// kernel: tpu_custom_call.1
= control target key start
LH: loop header
LB: loop body
LE: loop exit
PB: predicated region body
PF: predicated region fallthrough
CT: control target
= control target key end

     0   :  { %s776_s0 = inlined_call_operand.<no memory space> [shape: f32[1], index: 0, kind: input, shape index: {}]   ;;  %s777_s1 = inlined_call_operand.vmem [shape: f32[8,64], index: 1, kind: input, shape index: {}]   ;;  %s778_s2 = inlined_call_operand.vmem [shape: f32[256,64], index: 2, kind: input, shape index: {}]   ;;  %s779_s3 = inlined_call_operand.hbm [shape: f32[8,256], index: 3, kind: output, shape index: {}]  }
   0x1   :  { %8 = sst [smem:[#allocation2]] %s776_s0 }
   0x2   :  { %9 = vsyncpa [#allocation4], 0 }
   0x3   :  { %11 = vsyncpa [#allocation4 + $0x1], 0  ;;  %s633_s14 = smov 0   ;;  %s635_s15 = smov 0  }
   0x4   :  { %s637_s16 = smov 0   ;;  %s639_s17 = smov 0  }
   0x5 LB: > { %s654_s0 = sadd.s32 4294967295, %s604_s17   ;;  %s388_s18 = sadd.s32 4294967294, %s604_s17   ;;  %s604_s17 = sphi %s639_s17, %s787_s17   ;;  %s600_s16 = sphi %s637_s16, %s786_s16   ;;  %s596_s15 = sphi %s635_s15, %s785_s15   ;;  %s592_s14 = sphi %s633_s14, %s784_s14  }
   0x6   : > { %s658_s19 = sadd.s32 1, %s604_s17   ;;  %s92_s20 = sadd.s32 1, %s600_s16 }
   0x7   : > { %s89_s21 = ssub.s32 %s604_s17, %s658_s19  ;;  %p102_p0 = scmp.ne.s32.totalorder %s600_s16, %s596_s15 }
   0x8   : > { %p90_p1 = scmp.eq.s32.totalorder %s89_s21, 0  ;;  %p103_p2 = scmp.eq.s32.totalorder %s654_s0, 1 }
   0x9   : > { %p108_p3 = scmp.ne.s32.totalorder %s596_s15, %s592_s14  ;;  %p109_p4 = scmp.eq.s32.totalorder %s388_s18, 1 }
   0xa   : > { %s669_s22 = scalar_select %p90_p1, %s600_s16, %s92_s20  }
   0xb   : > { %p671_p5 = por %p103_p2, %p102_p0  ;;  %p675_p6 = por %p109_p4, %p108_p3 }
   0xc   : > { %p391_p7 = scmp.ge.s32.totalorder %s604_s17, 1  ;;  %p142_p8 = scmp.lt.s32.totalorder %s604_s17, 3 }
   0xe   : > { %p143_p9 = pnand %p391_p7, %p142_p8 }
   0xf   : > { %s393_s25 = sshll.u32 (!%p143_p9), %s654_s0, 4  ;;  %v606_v0 = vmov (!%p143_p9), 0.0|0.0   ;;  %vm607_vm0 = vmmov (!%p143_p9), 0   ;;  %v608_v1 = vmov (!%p143_p9), 0.0   ;;  %vm189_vm1 = vcmask (!%p143_p9), 523264   ;;  %v172_v27 = vld [vmem:[%s777_s1] sm:$0xff] (!%p143_p9) }
  0x10   : > { %146 = sbr.rel (%p143_p9) target bundleno = 320 (0x140), region = 32  ;;  %468 = vmatprep.subr.bf16.mxu0 (!%p143_p9), %v606_v0  ;;  %p167_p10 = scmp.lt.s32.totalorder (!%p143_p9), %s393_s25, 31  ;;  %465 = vmatprep.mubr.msk.f32.mxu0 (!%p143_p9), %vm607_vm0, %v608_v1  ;;  %vm691_vm2 = vmpackc.low (!%p143_p9), %vm189_vm1, %vm189_vm1 }
  0x11   : > { %s163_s5 = sand.u32 (!%p143_p9), 1, %s596_s15   ;;  %s311_s6 = sld [smem:[#allocation2]] (!%p143_p9) }
  0x12   : > { %s392_s7 = sshll.u32 (!%p143_p9), %s163_s5, 3  ;;  %s413_s8 = sshll.u32 (!%p143_p9), %s654_s0, 7 }
  0x13   : > { %s165_s9 = scalar_lea.vmem (!%p143_p9), [#allocation3], %s392_s7  ;;  %s734_s13 = scalar_lea.hbm (!%p143_p9), %s779_s3, %s413_s8 }
  0x14   : > { %s329_s10 = sshll.u32 (!%p143_p9), %s165_s9, 4  ;;  %s316_s18 = scalar_lea.sflag (!%p143_p9), [#allocation4], %s163_s5  ;;  %s736_s10 = int_to_ptr.vmem [resolvable:$true] %s329_s10 }
  0x15   : > { %s542_s20 = scalar_lea.vmem (!%p143_p9), %s736_s10, 128  ;;  %s609_s0 = smov (!%p143_p9), [#allocation3]  }
  0x16   : > { %p543_p11 = scmp.ne.s32.totalorder (!%p143_p9), %s736_s10, %s542_s20  ;;  %s546_s21 = sshll.u32 (!%p143_p9), %s609_s0, 4  ;;  %s547_s21 = int_to_ptr.vmem [resolvable:$false] %s546_s21 }
  0x17   : > { %s789_s25 = smov (!%p167_p10, %s393_s25), 31  ;;  %v312_v28 = vstv %s311_s6  ;;  %p549_p0 = scmp.lt.s32.totalorder %s736_s10, %s547_s21 }
  0x18   : > { %s394_s26 = sshll.u32 %s789_s25, 3  ;;  %p544_p12 = pnand %p543_p11, %p671_p5 }
  0x19   : > { %s685_s29 = scalar_lea.vmem %s778_s2, %s394_s26  ;;  %s548_s25 = scalar_lea.vmem %s547_s21, 256 }
  0x1a   : > { %v173_v2 = vld [vmem:[%s685_s29] sm:$0xff]  ;;  %v174_v3 = vld [vmem:[%s685_s29 + $0x8] sm:$0xff]  ;;  %v175_v6 = vld [vmem:[%s685_s29 + $0x10] sm:$0xff]  ;;  %p545_p13 = pneg %p544_p12  ;;  %p550_p1 = scmp.lt.s32.totalorder %s548_s25, %s542_s20 }
  0x1b   : > { %v469_v5 = vpack.c.bf16 %v174_v3, %v173_v2  ;;  %v176_v7 = vld [vmem:[%s685_s29 + $0x18] sm:$0xff]  ;;  %v177_v9 = vld [vmem:[%s685_s29 + $0x20] sm:$0xff]  ;;  %v178_v10 = vld [vmem:[%s685_s29 + $0x28] sm:$0xff] }
  0x1c   : > { %v473_v8 = vpack.c.bf16 %v176_v7, %v175_v6  ;;  %v477_v11 = vpack.c.bf16 %v178_v10, %v177_v9  ;;  %v179_v12 = vld [vmem:[%s685_s29 + $0x30] sm:$0xff]  ;;  %v180_v13 = vld [vmem:[%s685_s29 + $0x38] sm:$0xff]  ;;  %v181_v15 = vld [vmem:[%s685_s29 + $0x40] sm:$0xff]  ;;  %p551_p2 = por %p550_p1, %p549_p0 }
  0x1d   : > { %471 = vmatpush3.bf16.xpose.msk.msra.mxu0 %vm691_vm2, %v469_v5  ;;  %v481_v14 = vpack.c.bf16 %v180_v13, %v179_v12  ;;  %v182_v16 = vld [vmem:[%s685_s29 + $0x48] sm:$0xff]  ;;  %v183_v18 = vld [vmem:[%s685_s29 + $0x50] sm:$0xff]  ;;  %v184_v19 = vld [vmem:[%s685_s29 + $0x58] sm:$0xff] }
  0x1e   : > { %472 = vmatprep.subr.bf16.mxu0 %v606_v0  ;;  %v485_v17 = vpack.c.bf16 %v182_v16, %v181_v15  ;;  %v489_v20 = vpack.c.bf16 %v184_v19, %v183_v18  ;;  %v185_v21 = vld [vmem:[%s685_s29 + $0x60] sm:$0xff]  ;;  %v186_v22 = vld [vmem:[%s685_s29 + $0x68] sm:$0xff]  ;;  %v187_v24 = vld [vmem:[%s685_s29 + $0x70] sm:$0xff]  ;;  %p552_p3 = pnand %p551_p2, %p545_p13 }
  0x1f   : > { %v493_v23 = vpack.c.bf16 %v186_v22, %v185_v21  ;;  %v188_v25 = vld [vmem:[%s685_s29 + $0x78] sm:$0xff] }
  0x20   : > { %v497_v26 = vpack.c.bf16 %v188_v25, %v187_v24 }
  0x25   : > { %475 = vmatpush3.bf16.xpose.msk.msra.mxu0 %vm691_vm2, %v473_v8 }
  0x26   : > { %476 = vmatprep.subr.bf16.mxu0 %v606_v0 }
  0x2d   : > { %479 = vmatpush3.bf16.xpose.msk.msra.mxu0 %vm691_vm2, %v477_v11 }
  0x2e   : > { %480 = vmatprep.subr.bf16.mxu0 %v606_v0 }
  0x35   : > { %483 = vmatpush3.bf16.xpose.msk.msra.mxu0 %vm691_vm2, %v481_v14 }
  0x36   : > { %484 = vmatprep.subr.bf16.mxu0 %v606_v0 }
  0x3d   : > { %487 = vmatpush3.bf16.xpose.msk.msra.mxu0 %vm691_vm2, %v485_v17 }
  0x3e   : > { %488 = vmatprep.subr.bf16.mxu0 %v606_v0 }
  0x45   : > { %491 = vmatpush3.bf16.xpose.msk.msra.mxu0 %vm691_vm2, %v489_v20 }
  0x46   : > { %492 = vmatprep.subr.bf16.mxu0 %v606_v0 }
  0x4d   : > { %495 = vmatpush3.bf16.xpose.msk.msra.mxu0 %vm691_vm2, %v493_v23 }
  0x4e   : > { %496 = vmatprep.subr.bf16.mxu0 %v606_v0 }
  0x55   : > { %499 = vmatpush3.bf16.xpose.msk.msra.mxu0 %vm691_vm2, %v497_v26 }
  0x5c   : > { %466 = vmatmul.mubr.msk.f32.vlgmr.msra.gmra.mrb[0].mxu0 %vm189_vm1, %v172_v27 }
 0x12f   : > { %v307_v29 = vpop.f32.mrb[0].mxu0 }
 0x130   : > { %v313_v30 = vmul.f32 %v312_v28, %v307_v29  ;;  %v467_v31 = vpop.f32.mrb[1].mxu0 }
 0x132   : > { %314 = vst [vmem:[%s165_s9] sm:$0xff] %v313_v30 }
 0x133   : > { %555 = shalt.err (!%p552_p3)
}
 0x134   : > { %s556_s26 = scalar_lea.hbm %s734_s13, 128  ;;  %s560_s29 = scalar_lea.hbm %s779_s3, 256 }
 0x135   : > { %p557_p4 = scmp.ne.s32.totalorder %s734_s13, %s556_s26  ;;  %p561_p9 = scmp.lt.u32.totalorder %s734_s13, %s779_s3 }
 0x136   : > { %p562_p10 = scmp.lt.u32.totalorder %s560_s29, %s556_s26  ;;  %p564_p12 = scmp.lt.u32.totalorder %s556_s26, %s734_s13 }
 0x137   : > { %p558_p7 = pnand %p557_p4, %p671_p5 }
 0x138   : > { %p563_p11 = por %p562_p10, %p561_p9 }
 0x139   : > { %p559_p8 = pneg %p558_p7 }
 0x13a   : > { %p565_p13 = por %p564_p12, %p563_p11 }
 0x13c   : > { %p566_p0 = pnand %p565_p13, %p559_p8 }
 0x13e   : > { %569 = shalt.err (!%p566_p0)
}
 0x13f   : > { %500 = dma.vmem_to_hbm [thread:$0]  (%p671_p5), %s736_s10, 128, %s734_s13, %s316_s18  }
 0x140 PF: > { %p506_p1 = scmp.ge.s32.totalorder %s604_s17, 2  ;;  %s341_s5 = sand.u32 1, %s592_s14  }
 0x141   : > { %s342_s6 = scalar_lea.sflag [#allocation4], %s341_s5 }
 0x142   : > { %p503_p2 = pnand %p506_p1, %p675_p6 }
 0x144   : > { %587 = dma.done.wait (!%p503_p2), %s342_s6, 128  }
 0x145   : > { %589 = vsyncadd (!%p503_p2), %s342_s6, 4294967168  ;;  %p14_p3 = scmp.ge.s32.totalorder %s658_s19, 4   ;;  %s784_s14 = smov %s596_s15 }
 0x146   : > { %s785_s15 = smov %s600_s16  ;;  %s786_s16 = smov %s669_s22 }
 0x147   : > { %s787_s17 = smov %s658_s19  ;;  %16 = sbr.rel (!%p14_p3) target bundleno = 5 (0x5), region = 67 }
 0x14e   :  { %347 = vsyncpa [#allocation4], 1 }
 0x14f   :  { %349 = vsyncpa [#allocation4 + $0x1], 1 }

</bundles_post_ra>
